<compile_context>
chip_gen: v7x
topology: tpu7x:2x2x1
jax: 0.10.0
libtpu: 0.0.40
codegen_flags: <defaults>
</compile_context>

<pallas_src>
import functools

import numpy as np
import jax
import jax.numpy as jnp
from jax.experimental import pallas as pl
from jax.experimental.pallas import tpu as pltpu


def _round_up(x: int, m: int) -> int:
    return ((x + m - 1) // m) * m


def _generator_kernel(x_ref, w1_ref, b1_ref, w2_ref, b2_ref, out_ref):
    # fc1: single lane-dense K-padded dot, f32 accumulate.
    h1 = jnp.dot(x_ref[...], w1_ref[...], preferred_element_type=jnp.float32)
    h1 = h1 + b1_ref[...]
    # LeakyReLU(0.2)
    h1 = jnp.where(h1 > 0, h1, 0.2 * h1)

    # fc2 + ReLU (bf16 operands into the MXU, f32 accumulate).
    h2 = jnp.dot(h1.astype(w2_ref.dtype), w2_ref[...],
                 preferred_element_type=jnp.float32)
    h2 = h2 + b2_ref[...]
    out_ref[...] = jnp.maximum(h2, 0.0).astype(out_ref.dtype)


def pack_generator_params(w1, b1, w2, b2, *, weight_dtype=jnp.bfloat16):
    """Pad + cast weights ONCE (hoisted out of the per-call path).

    w1: [K, ngh] with K = nz + attSize (layout for x @ W + b on the
    concatenated input), b1: [ngh] or [1, ngh], w2: [ngh, resSize],
    b2: [resSize] or [1, resSize].
    Returns (w1_p, b1_p, w2_p, b2_p) with all trailing dims padded to 128.
    """
    K, ngh = w1.shape
    res_size = w2.shape[1]
    K_p = _round_up(K, 128)
    ngh_p = _round_up(ngh, 128)
    res_p = _round_up(res_size, 128)

    w1_p = jnp.pad(w1, ((0, K_p - K), (0, ngh_p - ngh))).astype(weight_dtype)
    b1_p = jnp.pad(jnp.reshape(b1, (1, ngh)),
                   ((0, 0), (0, ngh_p - ngh))).astype(jnp.float32)
    w2_p = jnp.pad(w2, ((0, ngh_p - ngh), (0, res_p - res_size))).astype(weight_dtype)
    b2_p = jnp.pad(jnp.reshape(b2, (1, res_size)),
                   ((0, 0), (0, res_p - res_size))).astype(jnp.float32)
    return w1_p, b1_p, w2_p, b2_p


def _const_spec(shape):
    """Resident (constant-index) block, single-buffered."""
    try:
        return pl.BlockSpec(shape, lambda i: (0, 0), pipeline_mode=pl.Buffered(1))
    except TypeError:  # older BlockSpec without pipeline_mode kwarg
        return pl.BlockSpec(shape, lambda i: (0, 0))


@functools.partial(jax.jit, static_argnames=("res_size", "tile_b", "out_dtype"))
def generator_forward(noise, att, w1_p, b1_p, w2_p, b2_p, *,
                      res_size: int, tile_b: int = 512,
                      out_dtype=jnp.bfloat16):
    """noise: [B, nz] f32, att: [B, attSize] f32, packed weights from
    pack_generator_params -> [B, res_size] out_dtype."""
    B = noise.shape[0]
    K = noise.shape[1] + att.shape[1]
    K_p, ngh_p = w1_p.shape
    res_p = w2_p.shape[1]
    assert res_p >= res_size and K_p >= K

    # Batch tiling: multiples of 16 (bf16 sublane packing). Clamp so there are
    # >= 2 grid steps whenever the batch allows (keeps both v7x TCs busy).
    tile_b = max(16, min(_round_up(tile_b, 16), _round_up(B, 16)))
    if B > 16:
        tile_b = min(tile_b, _round_up((B + 1) // 2, 16))
    b_pad = _round_up(B, tile_b)
    grid = (b_pad // tile_b,)

    # Concat + pad to lane-dense K_p + cast (one fused wrapper op).
    x = jnp.concatenate([noise, att], axis=1)
    x_p = jnp.pad(x, ((0, b_pad - B), (0, K_p - K))).astype(w1_p.dtype)

    # VMEM footprint: single-buffered resident weights + double-buffered tiles.
    itm_w = np.dtype(w1_p.dtype).itemsize
    itm_o = np.dtype(out_dtype).itemsize
    weights_bytes = (K_p * ngh_p + ngh_p * res_p) * itm_w + (ngh_p + res_p) * 4
    tile_bytes = 2 * tile_b * K_p * itm_w + 2 * tile_b * res_p * itm_o
    scratch_bytes = tile_b * ngh_p * (4 + itm_w)  # h1 f32 + bf16 copy
    vmem_est = weights_bytes + tile_bytes + scratch_bytes

    try:
        vmem_cap = pltpu.get_tpu_info().vmem_capacity_bytes
    except Exception:  # conservative default (v7x has the smallest VMEM)
        vmem_cap = 64 * 1024 * 1024
    vmem_limit = int(min(max(int(1.25 * vmem_est), 32 * 1024 * 1024),
                         int(0.85 * vmem_cap)))

    batch_spec = lambda feat: pl.BlockSpec((tile_b, feat), lambda i: (i, 0))

    out_p = pl.pallas_call(
        _generator_kernel,
        out_shape=jax.ShapeDtypeStruct((b_pad, res_p), out_dtype),
        grid=grid,
        in_specs=[
            batch_spec(K_p),                 # x tile (concat(noise, att), padded)
            _const_spec((K_p, ngh_p)),       # W1, resident, single-buffered
            _const_spec((1, ngh_p)),         # b1
            _const_spec((ngh_p, res_p)),     # W2, resident, single-buffered
            _const_spec((1, res_p)),         # b2
        ],
        out_specs=batch_spec(res_p),
        compiler_params=pltpu.CompilerParams(
            dimension_semantics=("parallel",),
            vmem_limit_bytes=vmem_limit,
        ),
    )(x_p, w1_p, b1_p, w2_p, b2_p)

    return out_p[:B, :res_size]


def init_generator_params(key, att_size, nz, ngh, res_size):
    """Replicates weights_init: Linear weights ~ N(0, 0.02), biases = 0.
    Weights stored as [in, out] so forward is x @ W + b."""
    k1, k2 = jax.random.split(key)
    w1 = 0.02 * jax.random.normal(k1, (nz + att_size, ngh), dtype=jnp.float32)
    b1 = jnp.zeros((ngh,), dtype=jnp.float32)
    w2 = 0.02 * jax.random.normal(k2, (ngh, res_size), dtype=jnp.float32)
    b2 = jnp.zeros((res_size,), dtype=jnp.float32)
    return w1, b1, w2, b2


def reference_forward(noise, att, w1, b1, w2, b2):
    """Pure-JAX reference with the same bf16-weight / f32-accumulate arithmetic."""
    wd = jnp.bfloat16
    x = jnp.concatenate([noise, att], axis=1)
    h = (jnp.dot(x.astype(wd), w1.astype(wd),
                 preferred_element_type=jnp.float32)
         + jnp.reshape(b1, (1, -1)))
    h = jnp.where(h > 0, h, 0.2 * h)
    h = (jnp.dot(h.astype(wd), w2.astype(wd),
                 preferred_element_type=jnp.float32)
         + jnp.reshape(b2, (1, -1)))
    return jnp.maximum(h, 0.0)


if __name__ == "__main__":
    # Small, module-consistent shapes: cat(noise, att) -> fc1 -> fc2.
    B, attSize, nz, ngh, resSize = 8, 16, 16, 64, 128

    key = jax.random.PRNGKey(0)
    k_noise, k_att, k_params = jax.random.split(key, 3)

    noise = jax.random.normal(k_noise, (B, nz), dtype=jnp.float32)
    att = jax.random.normal(k_att, (B, attSize), dtype=jnp.float32)
    w1, b1, w2, b2 = init_generator_params(k_params, attSize, nz, ngh, resSize)

    # Pack weights once (padding + bf16 cast hoisted out of the call path).
    w1_p, b1_p, w2_p, b2_p = pack_generator_params(w1, b1, w2, b2)

    # f32-output path for the precision check.
    out = generator_forward(noise, att, w1_p, b1_p, w2_p, b2_p,
                            res_size=resSize, out_dtype=jnp.float32)
    out = jax.block_until_ready(out)

    ref = reference_forward(noise, att, w1, b1, w2, b2)
    assert out.shape == (B, resSize)
    assert bool(jnp.all(out >= 0.0))
    assert jnp.allclose(out, ref, atol=1e-3, rtol=1e-2), (
        f"max abs diff {float(jnp.max(jnp.abs(out - ref)))}")

    # Default bf16-output path (halves writeback HBM traffic).
    out_bf16 = generator_forward(noise, att, w1_p, b1_p, w2_p, b2_p,
                                 res_size=resSize)
    out_bf16 = jax.block_until_ready(out_bf16)
    assert out_bf16.shape == (B, resSize)
    assert out_bf16.dtype == jnp.bfloat16
    assert jnp.allclose(out_bf16.astype(jnp.float32), ref, atol=2e-2, rtol=2e-2)

    print("KERNEL_OK")
</pallas_src>

<mosaic_0001>
module attributes {stable_mosaic.version = 11 : i64} {
  func.func @_generator_kernel(%arg0: i32, %arg1: memref<16x128xbf16, #tpu.memory_space<vmem>>, %arg2: memref<128x128xbf16, #tpu.memory_space<vmem>>, %arg3: memref<1x128xf32, #tpu.memory_space<vmem>>, %arg4: memref<128x128xbf16, #tpu.memory_space<vmem>>, %arg5: memref<1x128xf32, #tpu.memory_space<vmem>>, %arg6: memref<16x128xf32, #tpu.memory_space<vmem>>) attributes {dimension_semantics = [#tpu.dimension_semantics<parallel>], iteration_bounds = array<i64: 1>, scalar_prefetch = 0 : i64, scratch_operands = 0 : i64, tpu.core_type = #tpu.core_type<tc>, window_params = [{transform_indices = @transform_0, window_bounds = array<i64: 16, 128>}, {pipeline_mode = #tpu.pipeline_mode<synchronous>, transform_indices = @transform_1, window_bounds = array<i64: 128, 128>}, {pipeline_mode = #tpu.pipeline_mode<synchronous>, transform_indices = @transform_2, window_bounds = array<i64: 1, 128>}, {pipeline_mode = #tpu.pipeline_mode<synchronous>, transform_indices = @transform_3, window_bounds = array<i64: 128, 128>}, {pipeline_mode = #tpu.pipeline_mode<synchronous>, transform_indices = @transform_4, window_bounds = array<i64: 1, 128>}, {transform_indices = @transform_5, window_bounds = array<i64: 16, 128>}]} {
    %c0 = arith.constant 0 : index
    %c0_0 = arith.constant 0 : index
    %0 = vector.load %arg1[%c0, %c0_0] : memref<16x128xbf16, #tpu.memory_space<vmem>>, vector<16x128xbf16>
    %c0_1 = arith.constant 0 : index
    %c0_2 = arith.constant 0 : index
    %1 = vector.load %arg2[%c0_1, %c0_2] : memref<128x128xbf16, #tpu.memory_space<vmem>>, vector<128x128xbf16>
    %cst = arith.constant dense<0.000000e+00> : vector<16x128xf32>
    %2 = tpu.matmul %0, %1, %cst {dimension_numbers = #tpu.dot_dimension_numbers<[1], [0], [0], [1], [0, 0, 1, 1], [], []>} : vector<16x128xbf16>, vector<128x128xbf16>, vector<16x128xf32> -> vector<16x128xf32>
    %c0_3 = arith.constant 0 : index
    %c0_4 = arith.constant 0 : index
    %3 = vector.load %arg3[%c0_3, %c0_4] : memref<1x128xf32, #tpu.memory_space<vmem>>, vector<1x128xf32>
    %4 = vector.broadcast %3 : vector<1x128xf32> to vector<16x128xf32>
    %5 = arith.addf %2, %4 : vector<16x128xf32>
    %cst_5 = arith.constant 0.000000e+00 : f32
    %6 = vector.broadcast %cst_5 : f32 to vector<16x128xf32>
    %7 = arith.cmpf ogt, %5, %6 : vector<16x128xf32>
    %cst_6 = arith.constant 2.000000e-01 : f32
    %8 = vector.broadcast %cst_6 : f32 to vector<16x128xf32>
    %9 = arith.mulf %8, %5 : vector<16x128xf32>
    %10 = arith.select %7, %5, %9 : vector<16x128xi1>, vector<16x128xf32>
    %11 = arith.truncf %10 : vector<16x128xf32> to vector<16x128xbf16>
    %c0_7 = arith.constant 0 : index
    %c0_8 = arith.constant 0 : index
    %12 = vector.load %arg4[%c0_7, %c0_8] : memref<128x128xbf16, #tpu.memory_space<vmem>>, vector<128x128xbf16>
    %cst_9 = arith.constant dense<0.000000e+00> : vector<16x128xf32>
    %13 = tpu.matmul %11, %12, %cst_9 {dimension_numbers = #tpu.dot_dimension_numbers<[1], [0], [0], [1], [0, 0, 1, 1], [], []>} : vector<16x128xbf16>, vector<128x128xbf16>, vector<16x128xf32> -> vector<16x128xf32>
    %c0_10 = arith.constant 0 : index
    %c0_11 = arith.constant 0 : index
    %14 = vector.load %arg5[%c0_10, %c0_11] : memref<1x128xf32, #tpu.memory_space<vmem>>, vector<1x128xf32>
    %15 = vector.broadcast %14 : vector<1x128xf32> to vector<16x128xf32>
    %16 = arith.addf %13, %15 : vector<16x128xf32>
    %cst_12 = arith.constant 0.000000e+00 : f32
    %17 = vector.broadcast %cst_12 : f32 to vector<16x128xf32>
    %18 = arith.maximumf %16, %17 : vector<16x128xf32>
    %c0_13 = arith.constant 0 : index
    %c0_14 = arith.constant 0 : index
    %19 = vector.load %arg6[%c0_13, %c0_14] : memref<16x128xf32, #tpu.memory_space<vmem>>, vector<16x128xf32>
    tpu.vector_store %arg6[%c0_13, %c0_14], %18 {strides = array<i32>} : memref<16x128xf32, #tpu.memory_space<vmem>>, vector<16x128xf32>,
    return
  }
  func.func @transform_0(%arg0: i32) -> (i32, i32) {
    %c0_i32 = arith.constant 0 : i32
    %c0_i32_0 = arith.constant 0 : i32
    return %arg0, %c0_i32 : i32, i32
  }
  func.func @transform_1(%arg0: i32) -> (i32, i32) {
    %c0_i32 = arith.constant 0 : i32
    %c0_i32_0 = arith.constant 0 : i32
    %c0_i32_1 = arith.constant 0 : i32
    return %c0_i32, %c0_i32_0 : i32, i32
  }
  func.func @transform_2(%arg0: i32) -> (i32, i32) {
    %c0_i32 = arith.constant 0 : i32
    %c0_i32_0 = arith.constant 0 : i32
    %c0_i32_1 = arith.constant 0 : i32
    return %c0_i32, %c0_i32_0 : i32, i32
  }
  func.func @transform_3(%arg0: i32) -> (i32, i32) {
    %c0_i32 = arith.constant 0 : i32
    %c0_i32_0 = arith.constant 0 : i32
    %c0_i32_1 = arith.constant 0 : i32
    return %c0_i32, %c0_i32_0 : i32, i32
  }
  func.func @transform_4(%arg0: i32) -> (i32, i32) {
    %c0_i32 = arith.constant 0 : i32
    %c0_i32_0 = arith.constant 0 : i32
    %c0_i32_1 = arith.constant 0 : i32
    return %c0_i32, %c0_i32_0 : i32, i32
  }
  func.func @transform_5(%arg0: i32) -> (i32, i32) {
    %c0_i32 = arith.constant 0 : i32
    %c0_i32_0 = arith.constant 0 : i32
    return %arg0, %c0_i32 : i32, i32
  }
}

</mosaic_0001>

<bundles_post_ra>
// kernel: generator_forward.1
= control target key start
LH: loop header
LB: loop body
LE: loop exit
PB: predicated region body
PF: predicated region fallthrough
CT: control target
= control target key end

     0   :  { %10 = vsyncpa [#allocation3], 0  ;;  %s521_s0 = inlined_call_operand.vmem [shape: bf16[16,128], index: 0, kind: input, shape index: {}]   ;;  %s522_s1 = inlined_call_operand.hbm [shape: bf16[128,128], index: 1, kind: input, shape index: {}]   ;;  %s523_s2 = inlined_call_operand.vmem [shape: f32[1,128], index: 2, kind: input, shape index: {}]   ;;  %s524_s3 = inlined_call_operand.hbm [shape: bf16[128,128], index: 3, kind: input, shape index: {}]   ;;  %s525_s4 = inlined_call_operand.vmem [shape: f32[1,128], index: 4, kind: input, shape index: {}]   ;;  %s526_s5 = inlined_call_operand.vmem [shape: f32[16,128], index: 5, kind: output, shape index: {}]  }
   0x1   :  { %11 = vsyncpa [#allocation5], 0  ;;  %s446_s18 = smov [#allocation2]   ;;  %s398_s22 = scalar_lea.hbm %s522_s1, 1024 }
   0x2   :  { %s19_s19 = sshll.u32 %s446_s18, 4  ;;  %p399_p0 = scmp.ne.s32.totalorder %s522_s1, %s398_s22  ;;  %s20_s19 = int_to_ptr.vmem [resolvable:$true] %s19_s19 }
   0x3   :  { %p402_p1 = scmp.lt.u32.totalorder %s398_s22, %s522_s1 }
   0x5   :  { %p404_p2 = pnand %p402_p1, %p399_p0 }
   0x7   :  { %407 = shalt.err (!%p404_p2)
}
   0x8   :  { %s408_s27 = scalar_lea.vmem %s20_s19, 1024  ;;  %p413_p4 = scmp.lt.s32.totalorder %s20_s19, %s20_s19 }
   0x9   :  { %p409_p3 = scmp.ne.s32.totalorder %s20_s19, %s408_s27  ;;  %p414_p5 = scmp.lt.s32.totalorder %s408_s27, %s408_s27 }
   0xb   :  { %p415_p6 = por %p414_p5, %p413_p4 }
   0xd   :  { %p416_p7 = pnand %p415_p6, %p409_p3 }
   0xf   :  { %419 = shalt.err (!%p416_p7)
}
  0x10   :  { %s447_s28 = smov 64   ;;  %s448_s29 = smov 4  }
  0x11   :  { %25 = dma.hbm_to_vmem [thread:$0]  %s522_s1, 1024, %s20_s19, [#allocation3], %s447_s28, %s447_s28, %s448_s29  }
  0x12   :  { %s449_s7 = smov [#allocation4]   ;;  %s420_s11 = scalar_lea.hbm %s524_s3, 1024 }
  0x13   :  { %s33_s8 = sshll.u32 %s449_s7, 4  ;;  %p421_p8 = scmp.ne.s32.totalorder %s524_s3, %s420_s11  ;;  %s34_s8 = int_to_ptr.vmem [resolvable:$true] %s33_s8 }
  0x14   :  { %p424_p9 = scmp.lt.u32.totalorder %s420_s11, %s524_s3 }
  0x16   :  { %p426_p10 = pnand %p424_p9, %p421_p8 }
  0x18   :  { %429 = shalt.err (!%p426_p10)
}
  0x19   :  { %s430_s16 = scalar_lea.vmem %s34_s8, 1024  ;;  %p435_p12 = scmp.lt.s32.totalorder %s34_s8, %s34_s8 }
  0x1a   :  { %p431_p11 = scmp.ne.s32.totalorder %s34_s8, %s430_s16  ;;  %p436_p13 = scmp.lt.s32.totalorder %s430_s16, %s430_s16 }
  0x1c   :  { %p437_p0 = por %p436_p13, %p435_p12 }
  0x1e   :  { %p438_p1 = pnand %p437_p0, %p431_p11 }
  0x20   :  { %441 = shalt.err (!%p438_p1)
}
  0x21   :  { %39 = dma.hbm_to_vmem [thread:$0]  %s524_s3, 1024, %s34_s8, [#allocation5], %s447_s28, %s447_s28, %s448_s29  }
  0x22   :  { %442 = dma.done.wait [#allocation3], 1024  }
  0x23   :  { %443 = vsyncadd [#allocation3], 4294966272 }
  0x24   :  { %444 = dma.done.wait [#allocation5], 1024  }
  0x25   :  { %445 = vsyncadd [#allocation5], 4294966272  ;;  %v450_v0 = vmov 0.0   ;;  %vm451_vm0 = vmmov 0   ;;  %v381_v1 = vld [vmem:[#allocation2] sm:$0xff]   ;;  %v382_v2 = vld [vmem:[#allocation2 + $0x8] sm:$0xff]  }
  0x26   :  { %335 = vmatprep.subr.bf16.mxu0 %v450_v0  ;;  %351 = vmatprep.mubr.msk.bf16.mxu0 %vm451_vm0, %v450_v0  ;;  %v383_v3 = vld [vmem:[#allocation2 + $0x10] sm:$0xff]   ;;  %v390_v4 = vld [vmem:[#allocation4] sm:$0xff]   ;;  %v384_v5 = vld [vmem:[#allocation2 + $0x18] sm:$0xff]  }
  0x27   :  { %355 = vmatprep.subr.bf16.mxu1 %v450_v0  ;;  %371 = vmatprep.mubr.msk.bf16.mxu1 %vm451_vm0, %v450_v0  ;;  %v391_v6 = vld [vmem:[#allocation4 + $0x8] sm:$0xff]   ;;  %v385_v7 = vld [vmem:[#allocation2 + $0x20] sm:$0xff]   ;;  %v392_v8 = vld [vmem:[#allocation4 + $0x10] sm:$0xff]  }
  0x28   :  { %336 = vmatpush3.bf16.msra.mxu0 %v381_v1  ;;  %356 = vmatpush3.bf16.msra.mxu1 %v390_v4  ;;  %v386_v9 = vld [vmem:[#allocation2 + $0x28] sm:$0xff]   ;;  %v393_v10 = vld [vmem:[#allocation4 + $0x18] sm:$0xff]   ;;  %v387_v11 = vld [vmem:[#allocation2 + $0x30] sm:$0xff]  }
  0x29   :  { %337 = vmatprep.subr.bf16.mxu0 %v450_v0  ;;  %357 = vmatprep.subr.bf16.mxu1 %v450_v0  ;;  %v394_v12 = vld [vmem:[#allocation4 + $0x20] sm:$0xff]   ;;  %v388_v13 = vld [vmem:[#allocation2 + $0x38] sm:$0xff]   ;;  %v395_v14 = vld [vmem:[#allocation4 + $0x28] sm:$0xff]  }
  0x2a   :  { %v389_v15 = vld [vmem:[%s521_s0] sm:$0xff]   ;;  %v396_v16 = vld [vmem:[#allocation4 + $0x30] sm:$0xff]   ;;  %v397_v17 = vld [vmem:[#allocation4 + $0x38] sm:$0xff]  }
  0x2b   :  { %v298_v18 = vld [vmem:[%s523_s2] ss:$0 sm:$0xff] }
  0x2c   :  { %338 = vmatpush3.bf16.msra.mxu0 %v382_v2  ;;  %358 = vmatpush3.bf16.msra.mxu1 %v391_v6  ;;  %v308_v30 = vld [vmem:[%s525_s4] ss:$0 sm:$0xff] }
  0x2d   :  { %339 = vmatprep.subr.bf16.mxu0 %v450_v0  ;;  %359 = vmatprep.subr.bf16.mxu1 %v450_v0 }
  0x30   :  { %340 = vmatpush3.bf16.msra.mxu0 %v383_v3  ;;  %360 = vmatpush3.bf16.msra.mxu1 %v392_v8 }
  0x31   :  { %341 = vmatprep.subr.bf16.mxu0 %v450_v0  ;;  %361 = vmatprep.subr.bf16.mxu1 %v450_v0 }
  0x34   :  { %342 = vmatpush3.bf16.msra.mxu0 %v384_v5  ;;  %362 = vmatpush3.bf16.msra.mxu1 %v393_v10 }
  0x35   :  { %343 = vmatprep.subr.bf16.mxu0 %v450_v0  ;;  %363 = vmatprep.subr.bf16.mxu1 %v450_v0 }
  0x38   :  { %344 = vmatpush3.bf16.msra.mxu0 %v385_v7  ;;  %364 = vmatpush3.bf16.msra.mxu1 %v394_v12 }
  0x39   :  { %345 = vmatprep.subr.bf16.mxu0 %v450_v0  ;;  %365 = vmatprep.subr.bf16.mxu1 %v450_v0 }
  0x3c   :  { %346 = vmatpush3.bf16.msra.mxu0 %v386_v9  ;;  %366 = vmatpush3.bf16.msra.mxu1 %v395_v14 }
  0x3d   :  { %347 = vmatprep.subr.bf16.mxu0 %v450_v0  ;;  %367 = vmatprep.subr.bf16.mxu1 %v450_v0 }
  0x40   :  { %348 = vmatpush3.bf16.msra.mxu0 %v387_v11  ;;  %368 = vmatpush3.bf16.msra.mxu1 %v396_v16 }
  0x41   :  { %349 = vmatprep.subr.bf16.mxu0 %v450_v0  ;;  %369 = vmatprep.subr.bf16.mxu1 %v450_v0 }
  0x44   :  { %350 = vmatpush3.bf16.msra.mxu0 %v388_v13  ;;  %370 = vmatpush3.bf16.msra.mxu1 %v397_v17 }
  0x47   :  { %352 = vmatmul.mubr.bf16.vlgmr.msra.gmra.mrb[0].mxu0 %v389_v15 }
 0x11a   :  { %v162_v19 = vpop.f32.mrb[0].mxu0 }
 0x11b   :  { %v163_v20 = vadd.f32 %v298_v18, %v162_v19  ;;  %v353_v21 = vpop.f32.mrb[1].mxu0 }
 0x11c   :  { %v165_v22 = vpop.f32.mrb[2].mxu0 }
 0x11d   :  { %v171_v23 = vmul.f32 0.2, %v163_v20  ;;  %v166_v24 = vadd.f32 %v298_v18, %v165_v22  ;;  %v354_v25 = vpop.f32.mrb[3].mxu0  ;;  %vm169_vm1 = vcmp.gt.f32.partialorder %v163_v20, 0.0 }
 0x11f   :  { %vm170_vm2 = vcmp.gt.f32.partialorder %v166_v24, 0.0  ;;  %v172_v26 = vmul.f32 0.2, %v166_v24  ;;  %v173_v27 = vsel %vm169_vm1, %v163_v20, %v171_v23 }
 0x121   :  { %v174_v28 = vsel %vm170_vm2, %v166_v24, %v172_v26 }
 0x122   :  { %v175_v29 = vpack.c.bf16 %v174_v28, %v173_v27 }
 0x124   :  { %372 = vmatmul.mubr.bf16.vlgmr.msra.gmra.mrb[0].mxu1 %v175_v29 }
 0x1f7   :  { %v281_v31 = vpop.f32.mrb[0].mxu1 }
 0x1f8   :  { %v282_v32 = vadd.f32 %v308_v30, %v281_v31  ;;  %v373_v33 = vpop.f32.mrb[1].mxu1 }
 0x1f9   :  { %v284_v34 = vpop.f32.mrb[2].mxu1 }
 0x1fa   :  { %v288_v35 = vmax.f32 %v282_v32, 0.0  ;;  %v285_v36 = vadd.f32 %v308_v30, %v284_v34  ;;  %v374_v37 = vpop.f32.mrb[3].mxu1 }
 0x1fc   :  { %290 = vst [vmem:[%s526_s5] sm:$0xff] %v288_v35  ;;  %v289_v38 = vmax.f32 %v285_v36, 0.0 }
 0x1fe   :  { %291 = vst [vmem:[%s526_s5 + $0x8] sm:$0xff] %v289_v38 }
 0x1ff   :  { %296 = vsyncpa [#allocation3], 1 }
 0x200   :  { %297 = vsyncpa [#allocation5], 1 }

</bundles_post_ra>
